<compile_context>
chip_gen: v7x
topology: tpu7x:2x2x1
jax: 0.10.0
libtpu: 0.0.40
codegen_flags: <defaults>
</compile_context>

<pallas_src>
import functools

import jax
import jax.numpy as jnp
from jax.experimental import pallas as pl
from jax.experimental.pallas import tpu as pltpu

# DistanceLayer defaults (the ones used in ProtoryNet.forward).
DIST_ALPHA = 0.1
DIST_BETA = 1_000_000.0
HIDDEN = 128  # nn.LSTM(k_protos, 128)
_PAD_DIST_POISON = 1.0e6  # squared distance assigned to padded prototype lanes


def _round_up(x, m):
    return (x + m - 1) // m * m


def _protorynet_kernel(emb_ref, p_t_ref, p_sq_ref, w_ih_t_ref, b_ref,
                       w_c_ref, b_c_ref, out_ref, *, hidden, k_pad):
    # ---- fused F.normalize(p=2, dim=1) --------------------------------------
    e_raw = emb_ref[...]                                        # (TB, D) f32
    n2 = jnp.sum(e_raw * e_raw, axis=-1, keepdims=True)         # (TB, 1)
    # 1 / max(||e||, 1e-12)  ==  rsqrt(max(||e||^2, 1e-24))
    inv = jax.lax.rsqrt(jnp.maximum(n2, 1e-24))
    e = e_raw * inv
    # ||e||^2 of the normalized rows, reused from the norm already computed
    # (no second (TB, D) lane reduce).  Zero-padded rows stay exactly 0.
    e2 = n2 * (inv * inv)                                       # (TB, 1) ~ 1.0

    # ---- PrototypeLayer: squared L2 distances on the MXU ---------------------
    # dist = ||e||^2 + ||p||^2 - 2 e.p   (||p||^2 precomputed in the wrapper;
    # pad lanes carry +1e6 so they can never win the softmax below).
    dot = jnp.dot(e, p_t_ref[...],
                  preferred_element_type=jnp.float32)           # (TB, Kpad)
    dist = jnp.maximum(e2 + p_sq_ref[...] - 2.0 * dot, 0.0)     # (TB, Kpad)

    # ---- DistanceLayer (no pad-lane mask needed: poisoned p_sq handles it) ---
    scaled = dist * (-DIST_BETA)
    m = jnp.max(scaled, axis=-1, keepdims=True)
    ex = jnp.exp(scaled - m)                                    # 0 on pad lanes
    denom = jnp.sum(ex, axis=-1, keepdims=True)
    min_dist_ind = ex * pl.reciprocal(denom, approx=True)       # EUP divide
    e_dist = jnp.exp(-DIST_ALPHA * dist) + 1e-8
    dist_hot = min_dist_ind * e_dist                            # (TB, Kpad)

    # ---- LSTM, single step from zero state -----------------------------------
    # Forget gate multiplies c0 == 0 and was dropped at prepare time, so the
    # weight block holds only (i, g, o) -> width 3H.  Padded rows of W_ih^T are
    # zero and padded lanes of dist_hot are exactly zero, so the 128-wide
    # contraction is exact.  bf16 inputs, f32 accumulation; bias added in f32.
    gates = jnp.dot(dist_hot.astype(jnp.bfloat16), w_ih_t_ref[...],
                    preferred_element_type=jnp.float32) + b_ref[...]  # (TB, 3H)
    h = hidden
    i_g = jax.nn.sigmoid(gates[:, 0:h])
    g_g = jnp.tanh(gates[:, h:2 * h])
    o_g = jax.nn.sigmoid(gates[:, 2 * h:3 * h])
    h1 = o_g * jnp.tanh(i_g * g_g)                              # (TB, H)

    # ---- classifier (VPU mul + lane reduce; N=1 matmul would waste the MXU) --
    logits = jnp.sum(h1 * w_c_ref[...], axis=-1, keepdims=True) + b_c_ref[0, 0]
    pred = jax.nn.sigmoid(logits)                               # (TB, 1)

    # ---- lane-dense output slab: dist in lanes [0,K), prediction in last lane
    lane = jax.lax.broadcasted_iota(jnp.int32, dist.shape, 1)
    out_ref[...] = jnp.where(lane == k_pad - 1, pred, dist)


def prepare_protorynet_params(prototypes, w_ih, b_ih, b_hh, w_cls, b_cls):
    """One-time (model-load) preprocessing: transposes, bias fusion, forget-gate
    removal, bf16 weight copy, prototype-axis padding/poisoning.  All hoisted
    out of the per-call path."""
    p = jnp.asarray(prototypes, jnp.float32)                    # (K, D)
    k_protos, vect_size = p.shape
    h = HIDDEN
    k_pad = _round_up(k_protos + 1, 128)                        # spare lane for pred

    p_pad = jnp.zeros((k_pad, vect_size), jnp.float32).at[:k_protos].set(p)
    p_t = p_pad.T                                               # (D, Kpad)
    p_sq = jnp.sum(p_pad * p_pad, axis=1)                       # (Kpad,)
    # Poison padded lanes so the all-zero padded prototypes can never win the
    # (beta = 1e6) softmax; lets the kernel skip iota/compare/select masking.
    p_sq = jnp.where(jnp.arange(k_pad) < k_protos, p_sq,
                     _PAD_DIST_POISON).reshape(1, k_pad)        # (1, Kpad)

    # PyTorch LSTM gate order is (i, f, g, o); f multiplies c0 == 0 so it is
    # dropped entirely -> gate matmul width 3H instead of 4H.
    w = jnp.asarray(w_ih, jnp.float32)                          # (4H, K)
    b = jnp.asarray(b_ih, jnp.float32) + jnp.asarray(b_hh, jnp.float32)
    w_igo = jnp.concatenate([w[0:h], w[2 * h:3 * h], w[3 * h:4 * h]], axis=0)
    b_igo = jnp.concatenate([b[0:h], b[2 * h:3 * h], b[3 * h:4 * h]])
    w_ih_t = (jnp.zeros((k_pad, 3 * h), jnp.float32)
              .at[:k_protos].set(w_igo.T)
              .astype(jnp.bfloat16))                            # (Kpad, 3H) bf16
    bias = b_igo.reshape(1, 3 * h)                              # (1, 3H) f32

    w_c = jnp.asarray(w_cls, jnp.float32).reshape(1, h)         # (1, H)
    b_c = jnp.asarray(b_cls, jnp.float32).reshape(1, 1)         # (1, 1) -> SMEM

    return dict(prototypes=p, p_t=p_t, p_sq=p_sq, w_ih_t=w_ih_t, bias=bias,
                w_c=w_c, b_c=b_c, k_protos=k_protos, vect_size=vect_size,
                k_pad=k_pad)


def _choose_batch_tile(b, batch_tile, min_grid_steps=2):
    """Sublane-aligned batch tile that (a) avoids the host-side jnp.pad copy
    whenever a decent divisor of round_up(b, 8) exists, and (b) leaves at least
    `min_grid_steps` grid steps when b >= 16 so v7x can shard over its 2 TCs."""
    b8 = _round_up(max(int(b), 1), 8)
    cap = max(8, min(_round_up(max(int(batch_tile), 1), 8), b8))
    if b8 >= 8 * min_grid_steps:
        cap = min(cap, max(8, _round_up(pl.cdiv(b8, min_grid_steps), 8)))
    tb_div = 8
    for tb in range(cap, 7, -8):          # trace-time Python loop only
        if b8 % tb == 0:
            tb_div = tb
            break
    # Prefer the zero-padding divisor unless it would more than double the
    # number of grid steps; per-step overhead dominates in this mem-bound
    # kernel, so a few hundred padded rows are cheaper than many tiny tiles.
    return tb_div if 2 * tb_div >= cap else cap


def protorynet_forward(embeddings, params, *, batch_tile=1024,
                       core_parallel=False):
    """embeddings: (B, D) raw (un-normalized) sentence embeddings.
    Returns (predictions (B,), distances (B, 1, K), prototypes (K, D)),
    matching the PyTorch module's forward outputs."""
    emb = jnp.asarray(embeddings, jnp.float32)
    b, d = emb.shape
    k_protos = params["k_protos"]
    k_pad = params["k_pad"]
    h = HIDDEN
    assert d == params["vect_size"]

    tb = _choose_batch_tile(b, batch_tile)
    b_pad = _round_up(b, tb)
    if b_pad != b:
        # Rare path: tb is usually a divisor of round_up(b, 8), so this pads at
        # most 7 rows.  Zero rows are handled safely in-kernel and sliced off.
        emb = jnp.pad(emb, ((0, b_pad - b), (0, 0)))

    # Scoped-VMEM budget: double-buffered E tile + output slab + resident
    # weights + headroom for f32 temps; clamp to [32, 48] MiB — above the
    # 16/32 MiB default scoped limits, below v7x's 64 MiB physical VMEM.
    est = (2 * tb * d * 4 + 2 * tb * k_pad * 4 + 2 * d * k_pad * 4
           + k_pad * 3 * h * 2 + 6 * tb * max(k_pad, 3 * h) * 4)
    vmem_limit = int(min(48 * 2 ** 20, max(32 * 2 ** 20, 2 * est)))

    # Plain PARALLEL is kept as the portable default; on v7x pass
    # core_parallel=True so the (>= 2-step) batch grid is sharded across the
    # two TensorCores.
    sem = pltpu.CORE_PARALLEL if core_parallel else pltpu.PARALLEL

    kernel = functools.partial(_protorynet_kernel, hidden=h, k_pad=k_pad)

    slab = pl.pallas_call(
        kernel,
        out_shape=jax.ShapeDtypeStruct((b_pad, k_pad), jnp.float32),
        grid_spec=pltpu.PrefetchScalarGridSpec(
            num_scalar_prefetch=0,
            grid=(b_pad // tb,),
            in_specs=[
                pl.BlockSpec((tb, d), lambda i: (i, 0)),          # E (streamed)
                pl.BlockSpec((d, k_pad), lambda i: (0, 0)),       # P^T (resident)
                pl.BlockSpec((1, k_pad), lambda i: (0, 0)),       # ||p||^2 (+poison)
                pl.BlockSpec((k_pad, 3 * h), lambda i: (0, 0)),   # W_ih^T (i,g,o) bf16
                pl.BlockSpec((1, 3 * h), lambda i: (0, 0)),       # b_ih + b_hh
                pl.BlockSpec((1, h), lambda i: (0, 0)),           # classifier weight
                pl.BlockSpec((1, 1), lambda i: (0, 0),
                             memory_space=pltpu.MemorySpace.SMEM),  # classifier bias
            ],
            out_specs=pl.BlockSpec((tb, k_pad), lambda i: (i, 0)),
        ),
        compiler_params=pltpu.CompilerParams(
            dimension_semantics=(sem,),
            vmem_limit_bytes=vmem_limit),
    )(emb, params["p_t"], params["p_sq"], params["w_ih_t"], params["bias"],
      params["w_c"], params["b_c"])

    predictions = slab[:b, k_pad - 1]                # torch .squeeze() of (B, 1)
    distances = slab[:b, :k_protos].reshape(b, 1, k_protos)
    return predictions, distances, params["prototypes"]


def _reference_forward(emb, prototypes, w_ih, b_ih, b_hh, w_cls, b_cls):
    """Pure-JAX literal transcription of the PyTorch math (for validation)."""
    e = emb / jnp.maximum(jnp.linalg.norm(emb, axis=1, keepdims=True), 1e-12)
    diff = e[:, None, :] - prototypes[None, :, :]
    dist = jnp.sum(diff * diff, axis=-1)                         # (B, K)
    sm = jax.nn.softmax(-dist * DIST_BETA, axis=-1)
    dist_hot = sm * (jnp.exp(-DIST_ALPHA * dist) + 1e-8)
    gates = dist_hot @ w_ih.T + b_ih + b_hh
    hh = HIDDEN
    i_g = jax.nn.sigmoid(gates[:, :hh])
    g_g = jnp.tanh(gates[:, 2 * hh:3 * hh])
    o_g = jax.nn.sigmoid(gates[:, 3 * hh:])
    h1 = o_g * jnp.tanh(i_g * g_g)                               # c0 = 0 -> f drops
    logits = h1 @ w_cls.T + b_cls
    return jax.nn.sigmoid(logits)[:, 0], dist


if __name__ == "__main__":
    # Small, deterministic shapes consistent with the module's forward:
    #   B sentences, vect_size D, k_protos K, LSTM hidden 128.
    B, D, K, H = 8, 32, 8, HIDDEN

    key = jax.random.PRNGKey(0)
    k_emb, k_proto, k_wih, k_bih, k_bhh, k_wc, k_bc, k_emb2 = jax.random.split(key, 8)

    embeddings = jax.random.normal(k_emb, (B, D), jnp.float32)
    prototypes = jax.random.normal(k_proto, (K, D), jnp.float32)  # randn init

    # nn.LSTM(K, H) parameters (uniform(-1/sqrt(H), 1/sqrt(H)) like PyTorch).
    s = 1.0 / (H ** 0.5)
    w_ih = jax.random.uniform(k_wih, (4 * H, K), jnp.float32, -s, s)
    b_ih = jax.random.uniform(k_bih, (4 * H,), jnp.float32, -s, s)
    b_hh = jax.random.uniform(k_bhh, (4 * H,), jnp.float32, -s, s)

    # nn.Linear(H, 1)
    w_cls = jax.random.uniform(k_wc, (1, H), jnp.float32, -s, s)
    b_cls = jax.random.uniform(k_bc, (1,), jnp.float32, -s, s)

    params = prepare_protorynet_params(prototypes, w_ih, b_ih, b_hh, w_cls,
                                       b_cls)

    def check(emb_in):
        preds, dists, protos = protorynet_forward(emb_in, params)
        jax.block_until_ready((preds, dists, protos))
        n = emb_in.shape[0]
        assert preds.shape == (n,)
        assert dists.shape == (n, 1, K)
        assert protos.shape == (K, D)
        assert bool(jnp.all(jnp.isfinite(preds)))
        assert bool(jnp.all(jnp.isfinite(dists)))
        ref_pred, ref_dist = _reference_forward(emb_in, prototypes, w_ih, b_ih,
                                                b_hh, w_cls, b_cls)
        # Distances stay fully f32 inside the kernel -> tight tolerance.
        assert bool(jnp.allclose(dists[:, 0, :], ref_dist, rtol=1e-4,
                                 atol=1e-4)), "distance mismatch vs reference"
        # Predictions pass through the bf16-input / f32-accumulate gate matmul.
        assert bool(jnp.allclose(preds, ref_pred, rtol=2e-3, atol=5e-4)), \
            "prediction mismatch vs reference"

    # Small batch (single tile).
    check(embeddings)

    # Larger ragged batch: exercises the adaptive tile chooser (>= 2 grid
    # steps, tile is a divisor of round_up(B, 8) so no host-side pad copy).
    embeddings_big = jax.random.normal(k_emb2, (300, D), jnp.float32)
    check(embeddings_big)

    print("KERNEL_OK")
</pallas_src>

<mosaic_0001>
module attributes {stable_mosaic.version = 11 : i64} {
  func.func @_protorynet_kernel(%arg0: i32, %arg1: memref<8x32xf32, #tpu.memory_space<vmem>>, %arg2: memref<32x128xf32, #tpu.memory_space<vmem>>, %arg3: memref<1x128xf32, #tpu.memory_space<vmem>>, %arg4: memref<128x384xbf16, #tpu.memory_space<vmem>>, %arg5: memref<1x384xf32, #tpu.memory_space<vmem>>, %arg6: memref<1x128xf32, #tpu.memory_space<vmem>>, %arg7: memref<1x1xf32, #tpu.memory_space<smem>>, %arg8: memref<8x128xf32, #tpu.memory_space<vmem>>) attributes {dimension_semantics = [#tpu.dimension_semantics<parallel>], iteration_bounds = array<i64: 1>, scalar_prefetch = 0 : i64, scratch_operands = 0 : i64, tpu.core_type = #tpu.core_type<tc>, window_params = [{transform_indices = @transform_0, window_bounds = array<i64: 8, 32>}, {pipeline_mode = #tpu.pipeline_mode<synchronous>, transform_indices = @transform_1, window_bounds = array<i64: 32, 128>}, {pipeline_mode = #tpu.pipeline_mode<synchronous>, transform_indices = @transform_2, window_bounds = array<i64: 1, 128>}, {pipeline_mode = #tpu.pipeline_mode<synchronous>, transform_indices = @transform_3, window_bounds = array<i64: 128, 384>}, {pipeline_mode = #tpu.pipeline_mode<synchronous>, transform_indices = @transform_4, window_bounds = array<i64: 1, 384>}, {pipeline_mode = #tpu.pipeline_mode<synchronous>, transform_indices = @transform_5, window_bounds = array<i64: 1, 128>}, {transform_indices = @transform_6, window_bounds = array<i64: 1, 1>}, {transform_indices = @transform_7, window_bounds = array<i64: 8, 128>}]} {
    %c0 = arith.constant 0 : index
    %c0_0 = arith.constant 0 : index
    %0 = vector.load %arg1[%c0, %c0_0] : memref<8x32xf32, #tpu.memory_space<vmem>>, vector<8x32xf32>
    %1 = arith.mulf %0, %0 : vector<8x32xf32>
    %cst = arith.constant dense<0.000000e+00> : vector<8xf32>
    %2 = vector.multi_reduction <add>, %1, %cst [1] : vector<8x32xf32> to vector<8xf32>
    %3 = vector.shape_cast %2 : vector<8xf32> to vector<8x1xf32>
    %cst_1 = arith.constant 1.000000e-24 : f32
    %4 = vector.broadcast %cst_1 : f32 to vector<8x1xf32>
    %5 = arith.maximumf %3, %4 : vector<8x1xf32>
    %6 = math.rsqrt %5 : vector<8x1xf32>
    %7 = vector.broadcast %6 : vector<8x1xf32> to vector<8x32xf32>
    %8 = arith.mulf %0, %7 : vector<8x32xf32>
    %9 = arith.mulf %6, %6 : vector<8x1xf32>
    %10 = arith.mulf %3, %9 : vector<8x1xf32>
    %c0_2 = arith.constant 0 : index
    %c0_3 = arith.constant 0 : index
    %11 = vector.load %arg2[%c0_2, %c0_3] : memref<32x128xf32, #tpu.memory_space<vmem>>, vector<32x128xf32>
    %cst_4 = arith.constant dense<0.000000e+00> : vector<8x128xf32>
    %12 = tpu.matmul %8, %11, %cst_4 {dimension_numbers = #tpu.dot_dimension_numbers<[1], [0], [0], [1], [0, 0, 1, 1], [], []>} : vector<8x32xf32>, vector<32x128xf32>, vector<8x128xf32> -> vector<8x128xf32>
    %c0_5 = arith.constant 0 : index
    %c0_6 = arith.constant 0 : index
    %13 = vector.load %arg3[%c0_5, %c0_6] : memref<1x128xf32, #tpu.memory_space<vmem>>, vector<1x128xf32>
    %14 = vector.broadcast %10 : vector<8x1xf32> to vector<8x128xf32>
    %15 = vector.broadcast %13 : vector<1x128xf32> to vector<8x128xf32>
    %16 = arith.addf %14, %15 : vector<8x128xf32>
    %cst_7 = arith.constant 2.000000e+00 : f32
    %17 = vector.broadcast %cst_7 : f32 to vector<8x128xf32>
    %18 = arith.mulf %17, %12 : vector<8x128xf32>
    %19 = arith.subf %16, %18 : vector<8x128xf32>
    %cst_8 = arith.constant 0.000000e+00 : f32
    %20 = vector.broadcast %cst_8 : f32 to vector<8x128xf32>
    %21 = arith.maximumf %19, %20 : vector<8x128xf32>
    %cst_9 = arith.constant -1.000000e+06 : f32
    %22 = vector.broadcast %cst_9 : f32 to vector<8x128xf32>
    %23 = arith.mulf %21, %22 : vector<8x128xf32>
    %cst_10 = arith.constant dense<0xFF800000> : vector<8xf32>
    %24 = vector.multi_reduction <maximumf>, %23, %cst_10 [1] : vector<8x128xf32> to vector<8xf32>
    %25 = vector.shape_cast %24 : vector<8xf32> to vector<8x1xf32>
    %26 = vector.broadcast %25 : vector<8x1xf32> to vector<8x128xf32>
    %27 = arith.subf %23, %26 : vector<8x128xf32>
    %28 = math.exp %27 : vector<8x128xf32>
    %cst_11 = arith.constant dense<0.000000e+00> : vector<8xf32>
    %29 = vector.multi_reduction <add>, %28, %cst_11 [1] : vector<8x128xf32> to vector<8xf32>
    %30 = vector.shape_cast %29 : vector<8xf32> to vector<8x1xf32>
    %31 = tpu.reciprocal %30 {approx = true} : vector<8x1xf32> -> vector<8x1xf32>
    %32 = vector.broadcast %31 : vector<8x1xf32> to vector<8x128xf32>
    %33 = arith.mulf %28, %32 : vector<8x128xf32>
    %cst_12 = arith.constant -1.000000e-01 : f32
    %34 = vector.broadcast %cst_12 : f32 to vector<8x128xf32>
    %35 = arith.mulf %34, %21 : vector<8x128xf32>
    %36 = math.exp %35 : vector<8x128xf32>
    %cst_13 = arith.constant 9.99999993E-9 : f32
    %37 = vector.broadcast %cst_13 : f32 to vector<8x128xf32>
    %38 = arith.addf %36, %37 : vector<8x128xf32>
    %39 = arith.mulf %33, %38 : vector<8x128xf32>
    %40 = arith.truncf %39 : vector<8x128xf32> to vector<8x128xbf16>
    %c0_14 = arith.constant 0 : index
    %c0_15 = arith.constant 0 : index
    %41 = vector.load %arg4[%c0_14, %c0_15] : memref<128x384xbf16, #tpu.memory_space<vmem>>, vector<128x384xbf16>
    %cst_16 = arith.constant dense<0.000000e+00> : vector<8x384xf32>
    %42 = tpu.matmul %40, %41, %cst_16 {dimension_numbers = #tpu.dot_dimension_numbers<[1], [0], [0], [1], [0, 0, 1, 1], [], []>} : vector<8x128xbf16>, vector<128x384xbf16>, vector<8x384xf32> -> vector<8x384xf32>
    %c0_17 = arith.constant 0 : index
    %c0_18 = arith.constant 0 : index
    %43 = vector.load %arg5[%c0_17, %c0_18] : memref<1x384xf32, #tpu.memory_space<vmem>>, vector<1x384xf32>
    %44 = vector.broadcast %43 : vector<1x384xf32> to vector<8x384xf32>
    %45 = arith.addf %42, %44 : vector<8x384xf32>
    %46 = vector.extract_strided_slice %45 {offsets = [0, 0], sizes = [8, 128], strides = [1, 1]} : vector<8x384xf32> to vector<8x128xf32>
    %47 = arith.negf %46 : vector<8x128xf32>
    %48 = math.exp %47 : vector<8x128xf32>
    %cst_19 = arith.constant 1.000000e+00 : f32
    %49 = vector.broadcast %cst_19 : f32 to vector<8x128xf32>
    %50 = arith.addf %49, %48 : vector<8x128xf32>
    %51 = arith.divf %49, %50 : vector<8x128xf32>
    %52 = vector.extract_strided_slice %45 {offsets = [0, 128], sizes = [8, 128], strides = [1, 1]} : vector<8x384xf32> to vector<8x128xf32>
    %53 = math.tanh %52 : vector<8x128xf32>
    %54 = vector.extract_strided_slice %45 {offsets = [0, 256], sizes = [8, 128], strides = [1, 1]} : vector<8x384xf32> to vector<8x128xf32>
    %55 = arith.negf %54 : vector<8x128xf32>
    %56 = math.exp %55 : vector<8x128xf32>
    %cst_20 = arith.constant 1.000000e+00 : f32
    %57 = vector.broadcast %cst_20 : f32 to vector<8x128xf32>
    %58 = arith.addf %57, %56 : vector<8x128xf32>
    %59 = arith.divf %57, %58 : vector<8x128xf32>
    %60 = arith.mulf %51, %53 : vector<8x128xf32>
    %61 = math.tanh %60 : vector<8x128xf32>
    %62 = arith.mulf %59, %61 : vector<8x128xf32>
    %c0_21 = arith.constant 0 : index
    %c0_22 = arith.constant 0 : index
    %63 = vector.load %arg6[%c0_21, %c0_22] : memref<1x128xf32, #tpu.memory_space<vmem>>, vector<1x128xf32>
    %64 = vector.broadcast %63 : vector<1x128xf32> to vector<8x128xf32>
    %65 = arith.mulf %62, %64 : vector<8x128xf32>
    %cst_23 = arith.constant dense<0.000000e+00> : vector<8xf32>
    %66 = vector.multi_reduction <add>, %65, %cst_23 [1] : vector<8x128xf32> to vector<8xf32>
    %67 = vector.shape_cast %66 : vector<8xf32> to vector<8x1xf32>
    %c0_24 = arith.constant 0 : index
    %c0_25 = arith.constant 0 : index
    %68 = memref.load %arg7[%c0_24, %c0_25] : memref<1x1xf32, #tpu.memory_space<smem>>
    %69 = vector.broadcast %68 : f32 to vector<8x1xf32>
    %70 = arith.addf %67, %69 : vector<8x1xf32>
    %71 = arith.negf %70 : vector<8x1xf32>
    %72 = math.exp %71 : vector<8x1xf32>
    %cst_26 = arith.constant 1.000000e+00 : f32
    %73 = vector.broadcast %cst_26 : f32 to vector<8x1xf32>
    %74 = arith.addf %73, %72 : vector<8x1xf32>
    %75 = arith.divf %73, %74 : vector<8x1xf32>
    %76 = tpu.iota {dimensions = array<i32: 1>} : vector<8x128xi32>
    %c127_i32 = arith.constant 127 : i32
    %77 = vector.broadcast %c127_i32 : i32 to vector<8x128xi32>
    %78 = arith.cmpi eq, %76, %77 : vector<8x128xi32>
    %79 = vector.shape_cast %75 : vector<8x1xf32> to vector<8x1xf32>
    %80 = vector.broadcast %79 : vector<8x1xf32> to vector<8x128xf32>
    %81 = arith.select %78, %80, %21 : vector<8x128xi1>, vector<8x128xf32>
    %c0_27 = arith.constant 0 : index
    %c0_28 = arith.constant 0 : index
    %82 = vector.load %arg8[%c0_27, %c0_28] : memref<8x128xf32, #tpu.memory_space<vmem>>, vector<8x128xf32>
    tpu.vector_store %arg8[%c0_27, %c0_28], %81 {strides = array<i32>} : memref<8x128xf32, #tpu.memory_space<vmem>>, vector<8x128xf32>,
    return
  }
  func.func @transform_0(%arg0: i32) -> (i32, i32) {
    %c0_i32 = arith.constant 0 : i32
    %c0_i32_0 = arith.constant 0 : i32
    return %arg0, %c0_i32 : i32, i32
  }
  func.func @transform_1(%arg0: i32) -> (i32, i32) {
    %c0_i32 = arith.constant 0 : i32
    %c0_i32_0 = arith.constant 0 : i32
    %c0_i32_1 = arith.constant 0 : i32
    return %c0_i32, %c0_i32_0 : i32, i32
  }
  func.func @transform_2(%arg0: i32) -> (i32, i32) {
    %c0_i32 = arith.constant 0 : i32
    %c0_i32_0 = arith.constant 0 : i32
    %c0_i32_1 = arith.constant 0 : i32
    return %c0_i32, %c0_i32_0 : i32, i32
  }
  func.func @transform_3(%arg0: i32) -> (i32, i32) {
    %c0_i32 = arith.constant 0 : i32
    %c0_i32_0 = arith.constant 0 : i32
    %c0_i32_1 = arith.constant 0 : i32
    return %c0_i32, %c0_i32_0 : i32, i32
  }
  func.func @transform_4(%arg0: i32) -> (i32, i32) {
    %c0_i32 = arith.constant 0 : i32
    %c0_i32_0 = arith.constant 0 : i32
    %c0_i32_1 = arith.constant 0 : i32
    return %c0_i32, %c0_i32_0 : i32, i32
  }
  func.func @transform_5(%arg0: i32) -> (i32, i32) {
    %c0_i32 = arith.constant 0 : i32
    %c0_i32_0 = arith.constant 0 : i32
    %c0_i32_1 = arith.constant 0 : i32
    return %c0_i32, %c0_i32_0 : i32, i32
  }
  func.func @transform_6(%arg0: i32) -> (i32, i32) {
    %c0_i32 = arith.constant 0 : i32
    %c0_i32_0 = arith.constant 0 : i32
    %c0_i32_1 = arith.constant 0 : i32
    return %c0_i32, %c0_i32_0 : i32, i32
  }
  func.func @transform_7(%arg0: i32) -> (i32, i32) {
    %c0_i32 = arith.constant 0 : i32
    %c0_i32_0 = arith.constant 0 : i32
    return %arg0, %c0_i32 : i32, i32
  }
}

</mosaic_0001>

<bundles_post_ra>
// kernel: tpu_custom_call.1
= control target key start
LH: loop header
LB: loop body
LE: loop exit
PB: predicated region body
PF: predicated region fallthrough
CT: control target
= control target key end

     0   :  { %13 = vsyncpa [#allocation4], 0  ;;  %s869_s0 = inlined_call_operand.hbm [shape: f32[8,32], index: 0, kind: input, shape index: {}]   ;;  %s870_s1 = inlined_call_operand.hbm [shape: f32[32,128], index: 1, kind: input, shape index: {}]   ;;  %s871_s2 = inlined_call_operand.vmem [shape: f32[1,128], index: 2, kind: input, shape index: {}]   ;;  %s872_s3 = inlined_call_operand.hbm [shape: bf16[128,384], index: 3, kind: input, shape index: {}]   ;;  %s873_s4 = inlined_call_operand.vmem [shape: f32[1,384], index: 4, kind: input, shape index: {}]   ;;  %s874_s5 = inlined_call_operand.vmem [shape: f32[1,128], index: 5, kind: input, shape index: {}]   ;;  %s875_s6 = inlined_call_operand.<no memory space> [shape: f32[1,1], index: 6, kind: input, shape index: {}]   ;;  %s876_s7 = inlined_call_operand.hbm [shape: f32[8,128], index: 7, kind: output, shape index: {}]  }
   0x1   :  { %14 = vsyncpa [#allocation7], 0 }
   0x2   :  { %15 = vsyncpa [#allocation5], 0  ;;  %s740_s24 = smov [#allocation6]   ;;  %s646_s28 = scalar_lea.hbm %s870_s1, 512 }
   0x3   :  { %s31_s25 = sshll.u32 %s740_s24, 4  ;;  %p647_p0 = scmp.ne.s32.totalorder %s870_s1, %s646_s28  ;;  %s32_s25 = int_to_ptr.vmem [resolvable:$true] %s31_s25 }
   0x4   :  { %p650_p1 = scmp.lt.u32.totalorder %s646_s28, %s870_s1 }
   0x6   :  { %p652_p2 = pnand %p650_p1, %p647_p0 }
   0x8   :  { %655 = shalt.err (!%p652_p2)
}
   0x9   :  { %s656_s10 = scalar_lea.vmem %s32_s25, 512  ;;  %p661_p4 = scmp.lt.s32.totalorder %s32_s25, %s32_s25 }
   0xa   :  { %p657_p3 = scmp.ne.s32.totalorder %s32_s25, %s656_s10  ;;  %p662_p5 = scmp.lt.s32.totalorder %s656_s10, %s656_s10 }
   0xc   :  { %p663_p6 = por %p662_p5, %p661_p4 }
   0xe   :  { %p664_p7 = pnand %p663_p6, %p657_p3 }
  0x10   :  { %667 = shalt.err (!%p664_p7)
}
  0x11   :  { %s741_s11 = smov 128   ;;  %s742_s12 = smov 8  }
  0x12   :  { %37 = dma.hbm_to_vmem [thread:$0]  %s870_s1, 512, %s32_s25, [#allocation7], %s741_s11, %s741_s11, %s742_s12  }
  0x13   :  { %s743_s15 = smov [#allocation3]   ;;  %s744_s17 = smov [#allocation8]  }
  0x14   :  { %s22_s16 = sshll.u32 %s743_s15, 4  ;;  %s45_s18 = sshll.u32 %s744_s17, 4  ;;  %s23_s16 = int_to_ptr.vmem [resolvable:$true] %s22_s16  ;;  %s46_s18 = int_to_ptr.vmem [resolvable:$true] %s45_s18 }
  0x15   :  { %s668_s21 = scalar_lea.hbm %s869_s0, 128 }
  0x16   :  { %p669_p8 = scmp.ne.s32.totalorder %s869_s0, %s668_s21  ;;  %p672_p9 = scmp.lt.u32.totalorder %s668_s21, %s869_s0 }
  0x18   :  { %p674_p10 = pnand %p672_p9, %p669_p8 }
  0x1a   :  { %677 = shalt.err (!%p674_p10)
}
  0x1b   :  { %s678_s1 = scalar_lea.vmem %s23_s16, 128  ;;  %p683_p12 = scmp.lt.s32.totalorder %s23_s16, %s23_s16 }
  0x1c   :  { %p679_p11 = scmp.ne.s32.totalorder %s23_s16, %s678_s1  ;;  %p684_p13 = scmp.lt.s32.totalorder %s678_s1, %s678_s1 }
  0x1e   :  { %p685_p0 = por %p684_p13, %p683_p12 }
  0x20   :  { %p686_p1 = pnand %p685_p0, %p679_p11 }
  0x22   :  { %689 = shalt.err (!%p686_p1)
}
  0x23   :  { %25 = dma.hbm_to_vmem [thread:$0]  %s869_s0, 128, %s23_s16, [#allocation4]  }
  0x24   :  { %s690_s30 = scalar_lea.hbm %s872_s3, 3072 }
  0x25   :  { %p691_p2 = scmp.ne.s32.totalorder %s872_s3, %s690_s30  ;;  %p694_p3 = scmp.lt.u32.totalorder %s690_s30, %s872_s3 }
  0x27   :  { %p696_p4 = pnand %p694_p3, %p691_p2 }
  0x29   :  { %699 = shalt.err (!%p696_p4)
}
  0x2a   :  { %s700_s12 = scalar_lea.vmem %s46_s18, 3072  ;;  %p705_p6 = scmp.lt.s32.totalorder %s46_s18, %s46_s18 }
  0x2b   :  { %p701_p5 = scmp.ne.s32.totalorder %s46_s18, %s700_s12  ;;  %p706_p7 = scmp.lt.s32.totalorder %s700_s12, %s700_s12 }
  0x2d   :  { %p707_p8 = por %p706_p7, %p705_p6 }
  0x2f   :  { %p708_p9 = pnand %p707_p8, %p701_p5 }
  0x31   :  { %711 = shalt.err (!%p708_p9)
}
  0x32   :  { %s745_s0 = smov 192   ;;  %s746_s13 = smov 12  }
  0x33   :  { %51 = dma.hbm_to_vmem [thread:$0]  %s872_s3, 3072, %s46_s18, [#allocation7], %s745_s0, %s745_s0, %s746_s13  }
  0x34   :  { %734 = dma.done.wait [#allocation4], 128  }
  0x35   :  { %735 = vsyncadd [#allocation4], 4294967168 }
  0x36   :  { %736 = dma.done.wait [#allocation7], 3584  }
  0x37   :  { %737 = vsyncadd [#allocation7], 4294963712  ;;  %v68_v0 = vld [vmem:[#allocation3] sm:$0xff]  ;;  %vm70_vm0 = vcmask 261120   ;;  %v79_v3 = vld [vmem:[#allocation6] sm:$0xff]  ;;  %v747_v6 = vmov 0.0|0.0   ;;  %v217_v63 = vlaneseq }
  0x38   :  { %v69_v1 = vmul.f32 %v68_v0, %v68_v0  ;;  %v80_v4 = vld [vmem:[#allocation6 + $0x8] sm:$0xff]  ;;  %572 = vmatprep.subr.bf16.mxu0 %v747_v6  ;;  %v81_v7 = vld [vmem:[#allocation6 + $0x10] sm:$0xff]  ;;  %v82_v8 = vld [vmem:[#allocation6 + $0x18] sm:$0xff]  ;;  %vm748_vm1 = vmmov 0   ;;  %v749_v10 = vmov 0.0   ;;  %v750_v48 = vmov 0  }
  0x39   :  { %v573_v5 = vpack.c.bf16 %v80_v4, %v79_v3  ;;  %v576_v9 = vpack.c.bf16 %v82_v8, %v81_v7  ;;  %549 = vmatprep.mubr.msk.f32.mxu0 %vm748_vm1, %v749_v10  ;;  %v498_v17 = vld [vmem:[%s871_s2] ss:$0 sm:$0xff]  ;;  %v590_v25 = vld [vmem:[#allocation8 + $0x4] ss:$12 sps:$4 sm:$0xff]   ;;  %v592_v26 = vld [vmem:[#allocation8] ss:$12 sps:$4 sm:$0xff]   ;;  %392 = vmatprep.mubr.bf16.mxu1 %v750_v48 }
  0x3a   :  { %v71_v2 = vsel %vm70_vm0, %v69_v1, 0.0  ;;  %v593_v27 = vld [vmem:[#allocation8 + $0x8] ss:$12 sps:$4 sm:$0xff]   ;;  %360 = vmatprep.subr.bf16.mxu1 %v590_v25  ;;  %v597_v29 = vld [vmem:[#allocation8 + $0x20] ss:$12 sps:$4 sm:$0xff]   ;;  %s751_s21 = smov [#allocation9]  }
  0x3b   :  { %72 = vadd.xlane.f32.xlu0 %v71_v2  ;;  %574 = vmatpush3.bf16.msra.mxu0 %v573_v5  ;;  %v594_v28 = vld [vmem:[#allocation8 + $0x1c] ss:$12 sps:$4 sm:$0xff]   ;;  %v596_v30 = vld [vmem:[#allocation8 + $0x18] ss:$12 sps:$4 sm:$0xff]   ;;  %v598_v31 = vld [vmem:[#allocation8 + $0x34] ss:$12 sps:$4 sm:$0xff]  }
  0x3c   :  { %575 = vmatprep.subr.bf16.mxu0 %v747_v6  ;;  %361 = vmatpush1.bf16.msra.mxu1 %v592_v26  ;;  %v601_v32 = vld [vmem:[#allocation8 + $0x38] ss:$12 sps:$4 sm:$0xff]   ;;  %v600_v33 = vld [vmem:[#allocation8 + $0x30] ss:$12 sps:$4 sm:$0xff]   ;;  %v604_v36 = vld [vmem:[#allocation8 + $0x48] ss:$12 sps:$4 sm:$0xff]  }
  0x3d   :  { %362 = vmatprep.subr.bf16.mxu1 %v594_v28  ;;  %v602_v34 = vld [vmem:[#allocation8 + $0x4c] ss:$12 sps:$4 sm:$0xff]   ;;  %v605_v35 = vld [vmem:[#allocation8 + $0x50] ss:$12 sps:$4 sm:$0xff]   ;;  %v609_v43 = vld [vmem:[#allocation8 + $0x68] ss:$12 sps:$4 sm:$0xff]  }
  0x3e   :  { %v606_v41 = vld [vmem:[#allocation8 + $0x64] ss:$12 sps:$4 sm:$0xff]   ;;  %v608_v42 = vld [vmem:[#allocation8 + $0x60] ss:$12 sps:$4 sm:$0xff]   ;;  %v610_v44 = vld [vmem:[#allocation8 + $0x7c] ss:$12 sps:$4 sm:$0xff]  }
  0x3f   :  { %577 = vmatpush3.bf16.msra.mxu0 %v576_v9  ;;  %v612_v45 = vld [vmem:[#allocation8 + $0x78] ss:$12 sps:$4 sm:$0xff]   ;;  %v613_v46 = vld [vmem:[#allocation8 + $0x80] ss:$12 sps:$4 sm:$0xff]   ;;  %v616_v49 = vld [vmem:[#allocation8 + $0x90] ss:$12 sps:$4 sm:$0xff]  }
  0x40   :  { %552 = vmatprep.subr.bf16.mxu0 %v749_v10  ;;  %363 = vmatpush1.bf16.msra.mxu1 %v596_v30  ;;  %v614_v47 = vld [vmem:[#allocation8 + $0x94] ss:$12 sps:$4 sm:$0xff]   ;;  %v617_v50 = vld [vmem:[#allocation8 + $0x98] ss:$12 sps:$4 sm:$0xff]   ;;  %v621_v53 = vld [vmem:[#allocation8 + $0xb0] ss:$12 sps:$4 sm:$0xff]  }
  0x41   :  { %364 = vmatprep.subr.bf16.mxu1 %v598_v31  ;;  %v618_v51 = vld [vmem:[#allocation8 + $0xac] ss:$12 sps:$4 sm:$0xff]   ;;  %v620_v52 = vld [vmem:[#allocation8 + $0xa8] ss:$12 sps:$4 sm:$0xff]   ;;  %s487_s22 = sshll.u32 %s751_s21, 4  ;;  %s488_s22 = int_to_ptr.vmem [resolvable:$true] %s487_s22 }
  0x42   :  { %v215_v2 = vld [vmem:[%s873_s4] sm:$0x7]  ;;  %p717_p11 = scmp.lt.s32.totalorder %s488_s22, %s488_s22 }
  0x43   :  { %v525_v31 = vld [vmem:[%s874_s5] ss:$0 sm:$0xff]  ;;  %s712_s5 = scalar_lea.vmem %s488_s22, 128 }
  0x44   :  { %365 = vmatpush1.bf16.msra.mxu1 %v600_v33  ;;  %p713_p10 = scmp.ne.s32.totalorder %s488_s22, %s712_s5  ;;  %p718_p12 = scmp.lt.s32.totalorder %s712_s5, %s712_s5 }
  0x45   :  { %366 = vmatprep.subr.bf16.mxu1 %v602_v34  ;;  %v468_v34 = vstv %s875_s6 }
  0x46   :  { %p719_p13 = por %p718_p12, %p717_p11 }
  0x48   :  { %367 = vmatpush1.bf16.msra.mxu1 %v604_v36  ;;  %p720_p0 = pnand %p719_p13, %p713_p10 }
  0x49   :  { %368 = vmatprep.subr.bf16.mxu1 %v606_v41 }
  0x4c   :  { %369 = vmatpush1.bf16.msra.mxu1 %v608_v42 }
  0x4d   :  { %370 = vmatprep.subr.bf16.mxu1 %v610_v44 }
  0x50   :  { %371 = vmatpush1.bf16.msra.mxu1 %v612_v45 }
  0x51   :  { %372 = vmatprep.subr.bf16.mxu1 %v614_v47 }
  0x54   :  { %373 = vmatpush1.bf16.msra.mxu1 %v616_v49 }
  0x55   :  { %374 = vmatprep.subr.bf16.mxu1 %v618_v51 }
  0x58   :  { %375 = vmatpush1.bf16.msra.mxu1 %v620_v52 }
  0xc8   :  { %v73_v11 = vpop.xlane.xlu0 %72 }
  0xc9   :  { %v74_v12 = vmax.f32 %v73_v11, 1e-24 }
  0xcb   :  { %622 = vrsqrt.f32 %v74_v12 }
  0xd5   :  { %v623_v13 = vpop.eup %622 }
  0xd6   :  { %v76_v14 = vmul.f32 %v623_v13, %v68_v0  ;;  %v77_v15 = vmul.f32 %v623_v13, %v623_v13  ;;  %v218_v0 = vshrl.u32 %v217_v63, 7 }
  0xd8   :  { %550 = vmatmul.mubr.msk.f32.vlgmr.msra.gmra.mrb[0].mxu0 %vm70_vm0, %v76_v14  ;;  %v78_v16 = vmul.f32 %v77_v15, %v73_v11  ;;  %v219_v1 = vsub.s32 0, %v218_v0  ;;  %v227_v4 = vsub.s32 2, %v218_v0 }
  0xd9   :  { %568 = vmatprep.mubr.msk.bf16.mxu0 %vm748_vm1, %v749_v10  ;;  %553 = vmatpush3.bf16.msra.mxu0 %v593_v27 }
  0xda   :  { %v163_v19 = vadd.f32 %v498_v17, %v78_v16  ;;  %554 = vmatprep.subr.bf16.mxu0 %v749_v10  ;;  %v220_v3 = vrot.slane %v215_v2, %v219_v1  ;;  %v228_v8 = vrot.slane %v215_v2, %v227_v4  ;;  %v223_v17 = vsub.s32 1, %v218_v0 }
  0xdd   :  { %555 = vmatpush3.bf16.msra.mxu0 %v597_v29 }
  0xde   :  { %556 = vmatprep.subr.bf16.mxu0 %v749_v10 }
  0xe1   :  { %557 = vmatpush3.bf16.msra.mxu0 %v601_v32 }
  0xe2   :  { %558 = vmatprep.subr.bf16.mxu0 %v749_v10 }
  0xe5   :  { %559 = vmatpush3.bf16.msra.mxu0 %v605_v35 }
  0xe6   :  { %560 = vmatprep.subr.bf16.mxu0 %v749_v10 }
  0xe9   :  { %561 = vmatpush3.bf16.msra.mxu0 %v609_v43 }
  0xea   :  { %562 = vmatprep.subr.bf16.mxu0 %v749_v10 }
  0xed   :  { %563 = vmatpush3.bf16.msra.mxu0 %v613_v46 }
  0xee   :  { %564 = vmatprep.subr.bf16.mxu0 %v749_v10 }
  0xf1   :  { %565 = vmatpush3.bf16.msra.mxu0 %v617_v50 }
  0xf2   :  { %566 = vmatprep.subr.bf16.mxu0 %v749_v10 }
  0xf5   :  { %567 = vmatpush3.bf16.msra.mxu0 %v621_v53 }
 0x1ab   :  { %v152_v18 = vpop.f32.mrb[0].mxu0 }
 0x1ac   :  { %v164_v20 = vmul.f32 2.0, %v152_v18  ;;  %v551_v21 = vpop.f32.mrb[1].mxu0 }
 0x1ae   :  { %v165_v22 = vsub.f32 %v163_v19, %v164_v20  ;;  %v224_v19 = vrot.slane %v215_v2, %v223_v17 }
 0x1b0   :  { %v836_v23 = vmax.f32 %v165_v22, 0.0 }
 0x1b2   :  { %v167_v24 = vmul.f32 -1000000.0, %v836_v23  ;;  %v177_v54 = vmul.f32 -0.1, %v836_v23 }
 0x1b4   :  { %168 = vmax.xlane.f32.xlu0 %v167_v24  ;;  %v178_v55 = vmul.f32 1.442695, %v177_v54 }
 0x241   :  { %v169_v37 = vpop.xlane.xlu0 %168 }
 0x242   :  { %v170_v38 = vsub.f32 %v167_v24, %v169_v37 }
 0x244   :  { %v171_v39 = vmul.f32 1.442695, %v170_v38 }
 0x246   :  { %624 = vpow2.f32 %v171_v39 }
 0x247   :  { %626 = vpow2.f32 %v178_v55 }
 0x250   :  { %v625_v40 = vpop.eup %624 }
 0x251   :  { %173 = vadd.xlane.f32.xlu1 %v625_v40  ;;  %v627_v57 = vpop.eup %626 }
 0x252   :  { %v180_v60 = vadd.f32 1e-08, %v627_v57 }
 0x2de   :  { %v174_v56 = vpop.xlane.xlu1 %173 }
 0x2df   :  { %628 = vrcp.f32 %v174_v56 }
 0x2e9   :  { %v629_v58 = vpop.eup %628 }
 0x2ea   :  { %v176_v59 = vmul.f32 %v629_v58, %v625_v40  ;;  %v477_v40 = vand.u32 127, %v217_v63 }
 0x2ec   :  { %v181_v61 = vmul.f32 %v180_v60, %v176_v59  ;;  %vm478_vm2 = vcmp.eq.s32.totalorder %v477_v40, 127 }
 0x2ee   :  { %v182_v62 = vpack.c.bf16 %v181_v61, %v181_v61 }
 0x2f0   :  { %393 = vmatmul.mubr.bf16.vlgmr.msra.gmra.mrb[0].mxu1 %v182_v62  ;;  %569 = vmatmul.mubr.bf16.vlgmr.msra.gmra.mrb[4].mxu0 %v182_v62 }
 0x3c3   :  { %v394_v5 = vpop.f32.mrb[0].mxu1  ;;  %v435_v6 = vpop.f32.mrb[4].mxu0 }
 0x3c4   :  { %v395_v7 = vadd.f32 %v394_v5, %v220_v3  ;;  %v396_v9 = vpop.f32.mrb[1].mxu1  ;;  %v570_v10 = vpop.f32.mrb[5].mxu0  ;;  %v436_v16 = vadd.f32 %v435_v6, %v228_v8 }
 0x3c5   :  { %v398_v11 = vpop.f32.mrb[2].mxu1  ;;  %v438_v12 = vpop.f32.mrb[6].mxu0  ;;  %v397_v20 = vadd.f32 %v396_v9, %v224_v19 }
 0x3c6   :  { %v523_v13 = vmul.f32 -1.442695, %v395_v7  ;;  %v399_v14 = vpop.f32.mrb[3].mxu1  ;;  %v571_v15 = vpop.f32.mrb[7].mxu0  ;;  %v524_v18 = vmul.f32 -1.442695, %v436_v16 }
 0x3c8   :  { %630 = vpow2.f32 %v523_v13 }
 0x3c9   :  { %632 = vpow2.f32 %v524_v18 }
 0x3ca   :  { %634 = vtanh.f32 %v397_v20 }
 0x3d2   :  { %v631_v21 = vpop.eup %630 }
 0x3d3   :  { %v444_v22 = vadd.f32 1.0, %v631_v21  ;;  %v633_v24 = vpop.eup %632 }
 0x3d4   :  { %v451_v25 = vadd.f32 1.0, %v633_v24  ;;  %v635_v26 = vpop.eup %634 }
 0x3d5   :  { %636 = vrcp.f32 %v444_v22 }
 0x3d6   :  { %638 = vrcp.f32 %v451_v25 }
 0x3df   :  { %v637_v27 = vpop.eup %636 }
 0x3e0   :  { %v454_v28 = vmul.f32 %v637_v27, %v635_v26  ;;  %v639_v29 = vpop.eup %638 }
 0x3e2   :  { %640 = vtanh.f32 %v454_v28 }
 0x3ec   :  { %v641_v30 = vpop.eup %640 }
 0x3ed   :  { %v456_v32 = vmul.f32 %v641_v30, %v639_v29 }
 0x3ef   :  { %v464_v33 = vmul.f32 %v525_v31, %v456_v32 }
 0x3f1   :  { %465 = vadd.xlane.f32.xlu1 %v464_v33 }
 0x47e   :  { %v466_v35 = vpop.xlane.xlu1 %465 }
 0x47f   :  { %v469_v36 = vadd.f32 %v468_v34, %v466_v35 }
 0x481   :  { %v526_v37 = vmul.f32 -1.442695, %v469_v36 }
 0x483   :  { %642 = vpow2.f32 %v526_v37 }
 0x48d   :  { %v643_v38 = vpop.eup %642 }
 0x48e   :  { %v473_v39 = vadd.f32 1.0, %v643_v38 }
 0x490   :  { %644 = vrcp.f32 %v473_v39 }
 0x49a   :  { %v645_v41 = vpop.eup %644 }
 0x49b   :  { %v479_v42 = vsel %vm478_vm2, %v645_v41, %v836_v23 }
 0x49c   :  { %480 = vst [vmem:[#allocation9] sm:$0xff] %v479_v42 }
 0x49d   :  { %723 = shalt.err (!%p720_p0)
}
 0x49e   :  { %s724_s24 = scalar_lea.hbm %s876_s7, 128 }
 0x49f   :  { %p725_p1 = scmp.ne.s32.totalorder %s876_s7, %s724_s24  ;;  %p728_p2 = scmp.lt.u32.totalorder %s724_s24, %s876_s7 }
 0x4a1   :  { %p730_p3 = pnand %p728_p2, %p725_p1 }
 0x4a3   :  { %733 = shalt.err (!%p730_p3)
}
 0x4a4   :  { %490 = dma.vmem_to_hbm [thread:$0]  %s488_s22, 128, %s876_s7, [#allocation5]  }
 0x4a5   :  { %738 = dma.done.wait [#allocation5], 128  }
 0x4a6   :  { %739 = vsyncadd [#allocation5], 4294967168 }
 0x4a7   :  { %494 = vsyncpa [#allocation4], 1 }
 0x4a8   :  { %495 = vsyncpa [#allocation7], 1 }
 0x4a9   :  { %496 = vsyncpa [#allocation5], 1 }

</bundles_post_ra>
